<compile_context>
chip_gen: v7x
topology: tpu7x:2x2x1
jax: 0.10.0
libtpu: 0.0.40
codegen_flags: <defaults>
</compile_context>

<pallas_src>
import functools

import jax
import jax.numpy as jnp
from jax.experimental import pallas as pl
from jax.experimental.pallas import tpu as pltpu

INPUT_SIZE = 784
HIDDEN = 50
NUM_CLASSES = 10

# Lane-dense padded feature sizes (multiples of 128).
HID_PAD = 128
OUT_PAD = 128


def mlp_kernel(x_ref, w1_ref, b1_ref, w2_ref, b2_ref, o_ref):
    # In-kernel cast to bf16 (input stays unpadded f32 in HBM; cast is free on VPU).
    x = x_ref[...].astype(jnp.bfloat16)
    # fc1: bf16 operands on the MXU, f32 accumulation.  K = 784 (unpadded).
    h = jnp.dot(x, w1_ref[...], preferred_element_type=jnp.float32)
    # Bias add + ReLU in f32 (v5e-friendly VPU path).
    h = jnp.maximum(h + b1_ref[...], 0.0)
    # fc2: cast activation to bf16 for the second MXU pass, f32 accumulation.
    out = jnp.dot(h.astype(jnp.bfloat16), w2_ref[...],
                  preferred_element_type=jnp.float32)
    # Write lane-dense bf16 output (halves writeback traffic).
    o_ref[...] = (out + b2_ref[...]).astype(o_ref.dtype)


def _round_up(a, b):
    return (a + b - 1) // b * b


def pad_params(w1, b1, w2, b2):
    """Pad/cast parameters ONCE (outside the per-forward hot path)."""
    w1_p = jnp.zeros((INPUT_SIZE, HID_PAD), jnp.bfloat16).at[:, :HIDDEN].set(
        w1.astype(jnp.bfloat16))
    b1_p = jnp.zeros((1, HID_PAD), jnp.float32).at[0, :HIDDEN].set(
        b1.reshape(-1).astype(jnp.float32))
    w2_p = jnp.zeros((HID_PAD, OUT_PAD), jnp.bfloat16).at[:HIDDEN, :NUM_CLASSES].set(
        w2.astype(jnp.bfloat16))
    b2_p = jnp.zeros((1, OUT_PAD), jnp.float32).at[0, :NUM_CLASSES].set(
        b2.reshape(-1).astype(jnp.float32))
    return w1_p, b1_p, w2_p, b2_p


@functools.partial(jax.jit, static_argnames=("tile_b",))
def neural_network_forward(x, w1_p, b1_p, w2_p, b2_p, *, tile_b=2048):
    """x: (N, 784) f32; params already padded by pad_params()."""
    n = x.shape[0]

    # Batch tile: at most `tile_b` rows, rounded to sublane width (8).
    # 2048 keeps double-buffered VMEM (~15 MiB with f32 x) safe on v7x's 64 MiB;
    # large enough that the ~0.35 us per-grid-step overhead is <10%.
    tb = min(tile_b, _round_up(n, 8))
    n_pad = _round_up(n, tb)
    if n_pad != n:
        x = jnp.pad(x, ((0, n_pad - n), (0, 0)))

    grid = (n_pad // tb,)

    # Honest mem-bound cost estimate: unpadded f32 x in, bf16 out, resident weights.
    cost = pl.CostEstimate(
        flops=2 * n_pad * (INPUT_SIZE * HID_PAD + HID_PAD * OUT_PAD),
        transcendentals=0,
        bytes_accessed=(n_pad * INPUT_SIZE * 4          # x (f32, unpadded)
                        + w1_p.size * 2 + w2_p.size * 2  # bf16 weights
                        + b1_p.size * 4 + b2_p.size * 4  # f32 biases
                        + n_pad * OUT_PAD * 2),          # bf16 output
    )

    out_p = pl.pallas_call(
        mlp_kernel,
        out_shape=jax.ShapeDtypeStruct((n_pad, OUT_PAD), jnp.bfloat16),
        grid_spec=pltpu.PrefetchScalarGridSpec(
            num_scalar_prefetch=0,
            grid=grid,
            in_specs=[
                # x streamed per batch tile; last dim == full array dim (784) is legal.
                pl.BlockSpec((tb, INPUT_SIZE), lambda i: (i, 0)),
                pl.BlockSpec((INPUT_SIZE, HID_PAD), lambda i: (0, 0)),  # w1 resident
                pl.BlockSpec((1, HID_PAD), lambda i: (0, 0)),           # b1 resident
                pl.BlockSpec((HID_PAD, OUT_PAD), lambda i: (0, 0)),     # w2 resident
                pl.BlockSpec((1, OUT_PAD), lambda i: (0, 0)),           # b2 resident
            ],
            out_specs=pl.BlockSpec((tb, OUT_PAD), lambda i: (i, 0)),
        ),
        compiler_params=pltpu.CompilerParams(
            # Batch tiles independent -> megacore sharding on v7x (no-op on v5e/v6e).
            dimension_semantics=("parallel",),
            vmem_limit_bytes=48 * 1024 * 1024,
        ),
        cost_estimate=cost,
    )(x, w1_p, b1_p, w2_p, b2_p)

    # Slice back to (N, 10) f32; fused inside this jit (no extra full-array copy op
    # outside, and the padded intermediate is bf16 so the re-read is half-width).
    return out_p[:n, :NUM_CLASSES].astype(jnp.float32)


def init_params(key):
    # Deterministic init mirroring nn.Linear's U(-1/sqrt(fan_in), 1/sqrt(fan_in)).
    k1, k2, k3, k4 = jax.random.split(key, 4)
    bound1 = 1.0 / (INPUT_SIZE ** 0.5)
    bound2 = 1.0 / (HIDDEN ** 0.5)
    w1 = jax.random.uniform(k1, (INPUT_SIZE, HIDDEN), jnp.float32, -bound1, bound1)
    b1 = jax.random.uniform(k2, (HIDDEN,), jnp.float32, -bound1, bound1)
    w2 = jax.random.uniform(k3, (HIDDEN, NUM_CLASSES), jnp.float32, -bound2, bound2)
    b2 = jax.random.uniform(k4, (NUM_CLASSES,), jnp.float32, -bound2, bound2)
    return w1, b1, w2, b2


if __name__ == "__main__":
    key = jax.random.PRNGKey(0)
    kx, kp = jax.random.split(key)
    batch = 8
    x = jax.random.normal(kx, (batch, INPUT_SIZE), jnp.float32)
    w1, b1, w2, b2 = init_params(kp)

    # Pad / cast weights once (outside the forward hot path).
    w1_p, b1_p, w2_p, b2_p = pad_params(w1, b1, w2, b2)

    out = neural_network_forward(x, w1_p, b1_p, w2_p, b2_p)
    out = jax.block_until_ready(out)

    # Pure-f32 reference; kernel uses bf16 operands + bf16 output -> loose tolerance.
    ref = jnp.maximum(x @ w1 + b1, 0.0) @ w2 + b2
    assert out.shape == (batch, NUM_CLASSES)
    assert jnp.allclose(out, ref, atol=5e-2, rtol=5e-2)

    print("KERNEL_OK")
</pallas_src>

<mosaic_0001>
module attributes {stable_mosaic.version = 11 : i64} {
  func.func @mlp_kernel(%arg0: i32, %arg1: memref<8x784xf32, #tpu.memory_space<vmem>>, %arg2: memref<784x128xbf16, #tpu.memory_space<vmem>>, %arg3: memref<1x128xf32, #tpu.memory_space<vmem>>, %arg4: memref<128x128xbf16, #tpu.memory_space<vmem>>, %arg5: memref<1x128xf32, #tpu.memory_space<vmem>>, %arg6: memref<8x128xbf16, #tpu.memory_space<vmem>>) attributes {dimension_semantics = [#tpu.dimension_semantics<parallel>], iteration_bounds = array<i64: 1>, scalar_prefetch = 0 : i64, scratch_operands = 0 : i64, tpu.core_type = #tpu.core_type<tc>, window_params = [{transform_indices = @transform_0, window_bounds = array<i64: 8, 784>}, {pipeline_mode = #tpu.pipeline_mode<synchronous>, transform_indices = @transform_1, window_bounds = array<i64: 784, 128>}, {pipeline_mode = #tpu.pipeline_mode<synchronous>, transform_indices = @transform_2, window_bounds = array<i64: 1, 128>}, {pipeline_mode = #tpu.pipeline_mode<synchronous>, transform_indices = @transform_3, window_bounds = array<i64: 128, 128>}, {pipeline_mode = #tpu.pipeline_mode<synchronous>, transform_indices = @transform_4, window_bounds = array<i64: 1, 128>}, {transform_indices = @transform_5, window_bounds = array<i64: 8, 128>}]} {
    %c0 = arith.constant 0 : index
    %c0_0 = arith.constant 0 : index
    %0 = vector.load %arg1[%c0, %c0_0] : memref<8x784xf32, #tpu.memory_space<vmem>>, vector<8x784xf32>
    %1 = arith.truncf %0 : vector<8x784xf32> to vector<8x784xbf16>
    %c0_1 = arith.constant 0 : index
    %c0_2 = arith.constant 0 : index
    %2 = vector.load %arg2[%c0_1, %c0_2] : memref<784x128xbf16, #tpu.memory_space<vmem>>, vector<784x128xbf16>
    %cst = arith.constant dense<0.000000e+00> : vector<8x128xf32>
    %3 = tpu.matmul %1, %2, %cst {dimension_numbers = #tpu.dot_dimension_numbers<[1], [0], [0], [1], [0, 0, 1, 1], [], []>} : vector<8x784xbf16>, vector<784x128xbf16>, vector<8x128xf32> -> vector<8x128xf32>
    %c0_3 = arith.constant 0 : index
    %c0_4 = arith.constant 0 : index
    %4 = vector.load %arg3[%c0_3, %c0_4] : memref<1x128xf32, #tpu.memory_space<vmem>>, vector<1x128xf32>
    %5 = vector.broadcast %4 : vector<1x128xf32> to vector<8x128xf32>
    %6 = arith.addf %3, %5 : vector<8x128xf32>
    %cst_5 = arith.constant 0.000000e+00 : f32
    %7 = vector.broadcast %cst_5 : f32 to vector<8x128xf32>
    %8 = arith.maximumf %6, %7 : vector<8x128xf32>
    %9 = arith.truncf %8 : vector<8x128xf32> to vector<8x128xbf16>
    %c0_6 = arith.constant 0 : index
    %c0_7 = arith.constant 0 : index
    %10 = vector.load %arg4[%c0_6, %c0_7] : memref<128x128xbf16, #tpu.memory_space<vmem>>, vector<128x128xbf16>
    %cst_8 = arith.constant dense<0.000000e+00> : vector<8x128xf32>
    %11 = tpu.matmul %9, %10, %cst_8 {dimension_numbers = #tpu.dot_dimension_numbers<[1], [0], [0], [1], [0, 0, 1, 1], [], []>} : vector<8x128xbf16>, vector<128x128xbf16>, vector<8x128xf32> -> vector<8x128xf32>
    %c0_9 = arith.constant 0 : index
    %c0_10 = arith.constant 0 : index
    %12 = vector.load %arg5[%c0_9, %c0_10] : memref<1x128xf32, #tpu.memory_space<vmem>>, vector<1x128xf32>
    %13 = vector.broadcast %12 : vector<1x128xf32> to vector<8x128xf32>
    %14 = arith.addf %11, %13 : vector<8x128xf32>
    %15 = arith.truncf %14 : vector<8x128xf32> to vector<8x128xbf16>
    %c0_11 = arith.constant 0 : index
    %c0_12 = arith.constant 0 : index
    %16 = vector.load %arg6[%c0_11, %c0_12] : memref<8x128xbf16, #tpu.memory_space<vmem>>, vector<8x128xbf16>
    tpu.vector_store %arg6[%c0_11, %c0_12], %15 {strides = array<i32>} : memref<8x128xbf16, #tpu.memory_space<vmem>>, vector<8x128xbf16>,
    return
  }
  func.func @transform_0(%arg0: i32) -> (i32, i32) {
    %c0_i32 = arith.constant 0 : i32
    %c0_i32_0 = arith.constant 0 : i32
    return %arg0, %c0_i32 : i32, i32
  }
  func.func @transform_1(%arg0: i32) -> (i32, i32) {
    %c0_i32 = arith.constant 0 : i32
    %c0_i32_0 = arith.constant 0 : i32
    %c0_i32_1 = arith.constant 0 : i32
    return %c0_i32, %c0_i32_0 : i32, i32
  }
  func.func @transform_2(%arg0: i32) -> (i32, i32) {
    %c0_i32 = arith.constant 0 : i32
    %c0_i32_0 = arith.constant 0 : i32
    %c0_i32_1 = arith.constant 0 : i32
    return %c0_i32, %c0_i32_0 : i32, i32
  }
  func.func @transform_3(%arg0: i32) -> (i32, i32) {
    %c0_i32 = arith.constant 0 : i32
    %c0_i32_0 = arith.constant 0 : i32
    %c0_i32_1 = arith.constant 0 : i32
    return %c0_i32, %c0_i32_0 : i32, i32
  }
  func.func @transform_4(%arg0: i32) -> (i32, i32) {
    %c0_i32 = arith.constant 0 : i32
    %c0_i32_0 = arith.constant 0 : i32
    %c0_i32_1 = arith.constant 0 : i32
    return %c0_i32, %c0_i32_0 : i32, i32
  }
  func.func @transform_5(%arg0: i32) -> (i32, i32) {
    %c0_i32 = arith.constant 0 : i32
    %c0_i32_0 = arith.constant 0 : i32
    return %arg0, %c0_i32 : i32, i32
  }
}

</mosaic_0001>

<bundles_post_ra>
// kernel: neural_network_forward.1
= control target key start
LH: loop header
LB: loop body
LE: loop exit
PB: predicated region body
PF: predicated region fallthrough
CT: control target
= control target key end

     0   :  { %10 = vsyncpa [#allocation3], 0  ;;  %s1156_s0 = inlined_call_operand.hbm [shape: f32[8,784], index: 0, kind: input, shape index: {}]   ;;  %s1157_s1 = inlined_call_operand.hbm [shape: bf16[784,128], index: 1, kind: input, shape index: {}]   ;;  %s1158_s2 = inlined_call_operand.vmem [shape: f32[1,128], index: 2, kind: input, shape index: {}]   ;;  %s1159_s3 = inlined_call_operand.hbm [shape: bf16[128,128], index: 3, kind: input, shape index: {}]   ;;  %s1160_s4 = inlined_call_operand.vmem [shape: f32[1,128], index: 4, kind: input, shape index: {}]   ;;  %s1161_s5 = inlined_call_operand.vmem [shape: bf16[8,128], index: 5, kind: output, shape index: {}]  }
   0x1   :  { %11 = vsyncpa [#allocation5], 0  ;;  %s1055_s18 = smov [#allocation4]   ;;  %s985_s22 = scalar_lea.hbm %s1157_s1, 6272 }
   0x2   :  { %s27_s19 = sshll.u32 %s1055_s18, 4  ;;  %p986_p0 = scmp.ne.s32.totalorder %s1157_s1, %s985_s22  ;;  %s28_s19 = int_to_ptr.vmem [resolvable:$true] %s27_s19 }
   0x3   :  { %p989_p1 = scmp.lt.u32.totalorder %s985_s22, %s1157_s1 }
   0x5   :  { %p991_p2 = pnand %p989_p1, %p986_p0 }
   0x7   :  { %994 = shalt.err (!%p991_p2)
}
   0x8   :  { %s995_s27 = scalar_lea.vmem %s28_s19, 6272  ;;  %p1000_p4 = scmp.lt.s32.totalorder %s28_s19, %s28_s19 }
   0x9   :  { %p996_p3 = scmp.ne.s32.totalorder %s28_s19, %s995_s27  ;;  %p1001_p5 = scmp.lt.s32.totalorder %s995_s27, %s995_s27 }
   0xb   :  { %p1002_p6 = por %p1001_p5, %p1000_p4 }
   0xd   :  { %p1003_p7 = pnand %p1002_p6, %p996_p3 }
   0xf   :  { %1006 = shalt.err (!%p1003_p7)
}
  0x10   :  { %s1056_s28 = smov 64   ;;  %s1057_s29 = smov 4  }
  0x11   :  { %33 = dma.hbm_to_vmem [thread:$0]  %s1157_s1, 6272, %s28_s19, [#allocation5], %s1056_s28, %s1056_s28, %s1057_s29  }
  0x12   :  { %s1058_s7 = smov [#allocation2]   ;;  %s1059_s9 = smov [#allocation6]  }
  0x13   :  { %s18_s8 = sshll.u32 %s1058_s7, 4  ;;  %s41_s10 = sshll.u32 %s1059_s9, 4  ;;  %s19_s8 = int_to_ptr.vmem [resolvable:$true] %s18_s8  ;;  %s42_s10 = int_to_ptr.vmem [resolvable:$true] %s41_s10 }
  0x14   :  { %s1007_s13 = scalar_lea.hbm %s1156_s0, 896 }
  0x15   :  { %p1008_p8 = scmp.ne.s32.totalorder %s1156_s0, %s1007_s13  ;;  %p1011_p9 = scmp.lt.u32.totalorder %s1007_s13, %s1156_s0 }
  0x17   :  { %p1013_p10 = pnand %p1011_p9, %p1008_p8 }
  0x19   :  { %1016 = shalt.err (!%p1013_p10)
}
  0x1a   :  { %s1017_s1 = scalar_lea.vmem %s19_s8, 896  ;;  %p1022_p12 = scmp.lt.s32.totalorder %s19_s8, %s19_s8 }
  0x1b   :  { %p1018_p11 = scmp.ne.s32.totalorder %s19_s8, %s1017_s1  ;;  %p1023_p13 = scmp.lt.s32.totalorder %s1017_s1, %s1017_s1 }
  0x1d   :  { %p1024_p0 = por %p1023_p13, %p1022_p12 }
  0x1f   :  { %p1025_p1 = pnand %p1024_p0, %p1018_p11 }
  0x21   :  { %1028 = shalt.err (!%p1025_p1)
}
  0x22   :  { %21 = dma.hbm_to_vmem [thread:$0]  %s1156_s0, 896, %s19_s8, [#allocation3]  }
  0x23   :  { %s1029_s22 = scalar_lea.hbm %s1159_s3, 1024 }
  0x24   :  { %p1030_p2 = scmp.ne.s32.totalorder %s1159_s3, %s1029_s22  ;;  %p1033_p3 = scmp.lt.u32.totalorder %s1029_s22, %s1159_s3 }
  0x26   :  { %p1035_p4 = pnand %p1033_p3, %p1030_p2 }
  0x28   :  { %1038 = shalt.err (!%p1035_p4)
}
  0x29   :  { %s1039_s27 = scalar_lea.vmem %s42_s10, 1024  ;;  %p1044_p6 = scmp.lt.s32.totalorder %s42_s10, %s42_s10 }
  0x2a   :  { %p1040_p5 = scmp.ne.s32.totalorder %s42_s10, %s1039_s27  ;;  %p1045_p7 = scmp.lt.s32.totalorder %s1039_s27, %s1039_s27 }
  0x2c   :  { %p1046_p8 = por %p1045_p7, %p1044_p6 }
  0x2e   :  { %p1047_p9 = pnand %p1046_p8, %p1040_p5 }
  0x30   :  { %1050 = shalt.err (!%p1047_p9)
}
  0x31   :  { %47 = dma.hbm_to_vmem [thread:$0]  %s1159_s3, 1024, %s42_s10, [#allocation5], %s1056_s28, %s1056_s28, %s1057_s29  }
  0x32   :  { %1051 = dma.done.wait [#allocation3], 896  }
  0x33   :  { %1052 = vsyncadd [#allocation3], 4294966400 }
  0x34   :  { %1053 = dma.done.wait [#allocation5], 7296  }
  0x35   :  { %1054 = vsyncadd [#allocation5], 4294960000  ;;  %v928_v0 = vld [vmem:[#allocation4 + $0x40] sm:$0xff]   ;;  %v932_v4 = vld [vmem:[#allocation4 + $0x48] sm:$0xff]   ;;  %v1060_v44 = vmov 0.0   ;;  %vm1061_vm0 = vmmov 0  }
  0x36   :  { %v929_v1 = vld [vmem:[#allocation4] sm:$0xff]   ;;  %818 = vmatprep.subr.bf16.mxu0 %v928_v0  ;;  %v933_v5 = vld [vmem:[#allocation4 + $0x8] sm:$0xff]   ;;  %v936_v8 = vld [vmem:[#allocation4 + $0x50] sm:$0xff]   ;;  %vm473_vm1 = vcmask 130048  }
  0x37   :  { %v930_v2 = vld [vmem:[#allocation4 + $0xc0] sm:$0xff]   ;;  %819 = vmatpush3.bf16.msra.mxu0 %v929_v1  ;;  %v934_v6 = vld [vmem:[#allocation4 + $0xc8] sm:$0xff]   ;;  %v937_v9 = vld [vmem:[#allocation4 + $0x10] sm:$0xff]  }
  0x38   :  { %v931_v3 = vld [vmem:[#allocation4 + $0x80] sm:$0xff]   ;;  %840 = vmatprep.subr.bf16.mxu1 %v930_v2  ;;  %820 = vmatprep.subr.bf16.mxu0 %v932_v4  ;;  %v935_v7 = vld [vmem:[#allocation4 + $0x88] sm:$0xff]   ;;  %v938_v10 = vld [vmem:[#allocation4 + $0xd0] sm:$0xff]  }
  0x39   :  { %841 = vmatpush3.bf16.msra.mxu1 %v931_v3  ;;  %v939_v11 = vld [vmem:[#allocation4 + $0x90] sm:$0xff]   ;;  %v940_v12 = vld [vmem:[#allocation4 + $0x58] sm:$0xff]   ;;  %v944_v16 = vld [vmem:[#allocation4 + $0x60] sm:$0xff]  }
  0x3a   :  { %842 = vmatprep.subr.bf16.mxu1 %v934_v6  ;;  %v941_v13 = vld [vmem:[#allocation4 + $0x18] sm:$0xff]   ;;  %v945_v17 = vld [vmem:[#allocation4 + $0x20] sm:$0xff]   ;;  %v948_v20 = vld [vmem:[#allocation4 + $0x68] sm:$0xff]  }
  0x3b   :  { %821 = vmatpush3.bf16.msra.mxu0 %v933_v5  ;;  %v942_v14 = vld [vmem:[#allocation4 + $0xd8] sm:$0xff]   ;;  %v946_v18 = vld [vmem:[#allocation4 + $0xe0] sm:$0xff]   ;;  %v949_v21 = vld [vmem:[#allocation4 + $0x28] sm:$0xff]  }
  0x3c   :  { %822 = vmatprep.subr.bf16.mxu0 %v936_v8  ;;  %v943_v15 = vld [vmem:[#allocation4 + $0x98] sm:$0xff]   ;;  %v947_v19 = vld [vmem:[#allocation4 + $0xa0] sm:$0xff]   ;;  %v950_v22 = vld [vmem:[#allocation4 + $0xe8] sm:$0xff]  }
  0x3d   :  { %843 = vmatpush3.bf16.msra.mxu1 %v935_v7  ;;  %v951_v23 = vld [vmem:[#allocation4 + $0xa8] sm:$0xff]   ;;  %v952_v24 = vld [vmem:[#allocation4 + $0x70] sm:$0xff]   ;;  %v956_v28 = vld [vmem:[#allocation4 + $0x78] sm:$0xff]  }
  0x3e   :  { %844 = vmatprep.subr.bf16.mxu1 %v938_v10  ;;  %v953_v25 = vld [vmem:[#allocation4 + $0x30] sm:$0xff]   ;;  %v957_v29 = vld [vmem:[#allocation4 + $0x38] sm:$0xff]   ;;  %v60_v34 = vld [vmem:[#allocation2] sm:$0xff] }
  0x3f   :  { %823 = vmatpush3.bf16.msra.mxu0 %v937_v9  ;;  %v954_v26 = vld [vmem:[#allocation4 + $0xf0] sm:$0xff]   ;;  %v958_v30 = vld [vmem:[#allocation4 + $0xf8] sm:$0xff]   ;;  %v67_v35 = vpack.c.bf16 %v60_v34, %v60_v34  ;;  %v960_v36 = vld [vmem:[#allocation4 + $0x140] sm:$0xff]  }
  0x40   :  { %824 = vmatprep.subr.bf16.mxu0 %v940_v12  ;;  %v955_v27 = vld [vmem:[#allocation4 + $0xb0] sm:$0xff]   ;;  %v959_v33 = vld [vmem:[#allocation4 + $0xb8] sm:$0xff]   ;;  %v63_v37 = vld [vmem:[#allocation2 + $0x18] sm:$0xff] }
  0x41   :  { %845 = vmatpush3.bf16.msra.mxu1 %v939_v11  ;;  %v61_v31 = vld [vmem:[#allocation2 + $0x8] sm:$0xff]  ;;  %v70_v38 = vpack.c.bf16 %v63_v37, %v63_v37  ;;  %v961_v39 = vld [vmem:[#allocation4 + $0x100] sm:$0xff]   ;;  %v62_v40 = vld [vmem:[#allocation2 + $0x10] sm:$0xff] }
  0x42   :  { %846 = vmatprep.subr.bf16.mxu1 %v942_v14  ;;  %v68_v32 = vpack.c.bf16 %v61_v31, %v61_v31  ;;  %v69_v41 = vpack.c.bf16 %v62_v40, %v62_v40  ;;  %v962_v42 = vld [vmem:[#allocation4 + $0x148] sm:$0xff]   ;;  %v964_v45 = vld [vmem:[#allocation4 + $0x150] sm:$0xff]   ;;  %v966_v47 = vld [vmem:[#allocation4 + $0x158] sm:$0xff]  }
  0x43   :  { %825 = vmatpush3.bf16.msra.mxu0 %v941_v13  ;;  %549 = vmatprep.mubr.bf16.mxu1 %v70_v38  ;;  %v963_v43 = vld [vmem:[#allocation4 + $0x108] sm:$0xff]   ;;  %v965_v46 = vld [vmem:[#allocation4 + $0x110] sm:$0xff]   ;;  %v967_v48 = vld [vmem:[#allocation4 + $0x118] sm:$0xff]  }
  0x44   :  { %826 = vmatprep.subr.bf16.mxu0 %v944_v16  ;;  %509 = vmatprep.mubr.bf16.mxu0 %v68_v32  ;;  %v968_v49 = vld [vmem:[#allocation4 + $0x160] sm:$0xff]   ;;  %v970_v51 = vld [vmem:[#allocation4 + $0x168] sm:$0xff]   ;;  %v65_v54 = vld [vmem:[#allocation2 + $0x28] sm:$0xff] }
  0x45   :  { %847 = vmatpush3.bf16.msra.mxu1 %v943_v15  ;;  %v969_v50 = vld [vmem:[#allocation4 + $0x120] sm:$0xff]   ;;  %v971_v52 = vld [vmem:[#allocation4 + $0x128] sm:$0xff]   ;;  %v972_v55 = vld [vmem:[#allocation4 + $0x170] sm:$0xff]   ;;  %v72_v56 = vpack.c.bf16 %v65_v54, %v65_v54 }
  0x46   :  { %848 = vmatprep.subr.bf16.mxu1 %v946_v18  ;;  %v976_v53 = vld [vmem:[#allocation4 + $0x180] sm:$0xff]   ;;  %v66_v57 = vld [vmem:[#allocation2 + $0x30] sm:$0xff]  ;;  %v973_v59 = vld [vmem:[#allocation4 + $0x130] sm:$0xff]  }
  0x47   :  { %827 = vmatpush3.bf16.msra.mxu0 %v945_v17  ;;  %v73_v58 = vpack.c.bf16 %v66_v57, %v66_v57  ;;  %v974_v60 = vld [vmem:[#allocation4 + $0x178] sm:$0xff]   ;;  %v64_v62 = vld [vmem:[#allocation2 + $0x20] sm:$0xff]  ;;  %v978_v1 = vld [vmem:[#allocation6 + $0x8] sm:$0xff]  }
  0x48   :  { %828 = vmatprep.subr.bf16.mxu0 %v948_v20  ;;  %v975_v61 = vld [vmem:[#allocation4 + $0x138] sm:$0xff]   ;;  %v71_v63 = vpack.c.bf16 %v64_v62, %v64_v62  ;;  %v977_v0 = vld [vmem:[#allocation6] sm:$0xff]   ;;  %v980_v3 = vld [vmem:[#allocation6 + $0x18] sm:$0xff]  }
  0x49   :  { %849 = vmatpush3.bf16.msra.mxu1 %v947_v19  ;;  %v979_v2 = vld [vmem:[#allocation6 + $0x10] sm:$0xff]   ;;  %v981_v4 = vld [vmem:[#allocation6 + $0x20] sm:$0xff]   ;;  %v982_v5 = vld [vmem:[#allocation6 + $0x28] sm:$0xff]  }
  0x4a   :  { %850 = vmatprep.subr.bf16.mxu1 %v950_v22  ;;  %v983_v6 = vld [vmem:[#allocation6 + $0x30] sm:$0xff]   ;;  %v984_v7 = vld [vmem:[#allocation6 + $0x38] sm:$0xff]   ;;  %v758_v9 = vld [vmem:[%s1158_s2] ss:$0 sm:$0xff] }
  0x4b   :  { %829 = vmatpush3.bf16.msra.mxu0 %v949_v21  ;;  %v809_v34 = vld [vmem:[%s1160_s4] ss:$0 sm:$0xff] }
  0x4c   :  { %830 = vmatprep.subr.bf16.mxu0 %v952_v24 }
  0x4d   :  { %851 = vmatpush3.bf16.msra.mxu1 %v951_v23 }
  0x4e   :  { %852 = vmatprep.subr.bf16.mxu1 %v954_v26 }
  0x4f   :  { %831 = vmatpush3.bf16.msra.mxu0 %v953_v25 }
  0x50   :  { %832 = vmatprep.subr.bf16.mxu0 %v956_v28 }
  0x51   :  { %853 = vmatpush3.bf16.msra.mxu1 %v955_v27 }
  0x52   :  { %854 = vmatprep.subr.bf16.mxu1 %v958_v30 }
  0x53   :  { %833 = vmatpush3.bf16.msra.mxu0 %v957_v29 }
  0x54   :  { %862 = vmatprep.subr.bf16.mxu0 %v960_v36 }
  0x55   :  { %855 = vmatpush3.bf16.msra.mxu1 %v959_v33 }
  0x56   :  { %510 = vmatmul.mubr.bf16.vlgmr.msra.gmra.mrb[0].mxu0 %v67_v35  ;;  %895 = vmatprep.subr.bf16.mxu1 %v1060_v44 }
  0x57   :  { %863 = vmatpush3.bf16.msra.mxu0 %v961_v39  ;;  %589 = vmatprep.mubr.bf16.mxu0 %v72_v56 }
  0x58   :  { %550 = vmatmul.mubr.bf16.vlgmr.msra.gmra.mrb[0].mxu1 %v69_v41  ;;  %864 = vmatprep.subr.bf16.mxu0 %v962_v42 }
  0x59   :  { %897 = vmatprep.mubr.msk.bf16.mxu1 %vm1061_vm0, %v1060_v44  ;;  %896 = vmatpush3.bf16.msra.mxu1 %v976_v53 }
  0x5a   :  { %901 = vmatprep.subr.bf16.mxu1 %v1060_v44 }
  0x5b   :  { %865 = vmatpush3.bf16.msra.mxu0 %v963_v43 }
  0x5c   :  { %866 = vmatprep.subr.bf16.mxu0 %v964_v45 }
  0x5f   :  { %867 = vmatpush3.bf16.msra.mxu0 %v965_v46 }
  0x60   :  { %868 = vmatprep.subr.bf16.mxu0 %v966_v47  ;;  %898 = vmatmul.mubr.msk.bf16.vlgmr.msra.gmra.mrb[4].mxu1 %vm473_vm1, %v73_v58 }
  0x61   :  { %917 = vmatprep.mubr.msk.bf16.mxu1 %vm1061_vm0, %v1060_v44  ;;  %902 = vmatpush3.bf16.msra.mxu1 %v977_v0 }
  0x62   :  { %903 = vmatprep.subr.bf16.mxu1 %v1060_v44 }
  0x63   :  { %869 = vmatpush3.bf16.msra.mxu0 %v967_v48 }
  0x64   :  { %870 = vmatprep.subr.bf16.mxu0 %v968_v49 }
  0x65   :  { %904 = vmatpush3.bf16.msra.mxu1 %v978_v1 }
  0x66   :  { %905 = vmatprep.subr.bf16.mxu1 %v1060_v44 }
  0x67   :  { %871 = vmatpush3.bf16.msra.mxu0 %v969_v50 }
  0x68   :  { %872 = vmatprep.subr.bf16.mxu0 %v970_v51 }
  0x69   :  { %906 = vmatpush3.bf16.msra.mxu1 %v979_v2 }
  0x6a   :  { %907 = vmatprep.subr.bf16.mxu1 %v1060_v44 }
  0x6b   :  { %873 = vmatpush3.bf16.msra.mxu0 %v971_v52 }
  0x6c   :  { %874 = vmatprep.subr.bf16.mxu0 %v972_v55 }
  0x6d   :  { %908 = vmatpush3.bf16.msra.mxu1 %v980_v3 }
  0x6e   :  { %909 = vmatprep.subr.bf16.mxu1 %v1060_v44 }
  0x6f   :  { %875 = vmatpush3.bf16.msra.mxu0 %v973_v59 }
  0x70   :  { %876 = vmatprep.subr.bf16.mxu0 %v974_v60 }
  0x71   :  { %910 = vmatpush3.bf16.msra.mxu1 %v981_v4 }
  0x72   :  { %911 = vmatprep.subr.bf16.mxu1 %v1060_v44 }
  0x73   :  { %877 = vmatpush3.bf16.msra.mxu0 %v975_v61 }
  0x75   :  { %912 = vmatpush3.bf16.msra.mxu1 %v982_v5 }
  0x76   :  { %590 = vmatmul.mubr.bf16.vlgmr.msra.gmra.mrb[4].mxu0 %v71_v63  ;;  %913 = vmatprep.subr.bf16.mxu1 %v1060_v44 }
  0x79   :  { %914 = vmatpush3.bf16.msra.mxu1 %v983_v6 }
  0x7a   :  { %915 = vmatprep.subr.bf16.mxu1 %v1060_v44 }
  0x7d   :  { %916 = vmatpush3.bf16.msra.mxu1 %v984_v7 }
 0x129   :  { %v834_v8 = vpop.f32.mrb[0].mxu0 }
 0x12a   :  { %v835_v10 = vpop.f32.mrb[1].mxu0 }
 0x12b   :  { %v836_v11 = vadd.f32 %v835_v10, %v834_v8  ;;  %v837_v12 = vpop.f32.mrb[2].mxu0  ;;  %v856_v13 = vpop.f32.mrb[0].mxu1 }
 0x12c   :  { %v838_v14 = vpop.f32.mrb[3].mxu0  ;;  %v857_v16 = vpop.f32.mrb[1].mxu1 }
 0x12d   :  { %v512_v15 = vadd.f32 %v836_v11, %v758_v9  ;;  %v858_v17 = vadd.f32 %v857_v16, %v856_v13  ;;  %v859_v18 = vpop.f32.mrb[2].mxu1 }
 0x12e   :  { %v860_v19 = vpop.f32.mrb[3].mxu1 }
 0x12f   :  { %v552_v20 = vadd.f32 %v858_v17, %v512_v15 }
 0x133   :  { %v631_v21 = vpop.f32.mrb[4].mxu1 }
 0x134   :  { %v899_v22 = vpop.f32.mrb[5].mxu1 }
 0x135   :  { %v634_v23 = vpop.f32.mrb[6].mxu1 }
 0x136   :  { %v900_v24 = vpop.f32.mrb[7].mxu1 }
 0x149   :  { %v878_v25 = vpop.f32.mrb[4].mxu0 }
 0x14a   :  { %v879_v26 = vpop.f32.mrb[5].mxu0 }
 0x14b   :  { %v880_v27 = vadd.f32 %v879_v26, %v878_v25  ;;  %v881_v28 = vpop.f32.mrb[6].mxu0 }
 0x14c   :  { %v882_v29 = vpop.f32.mrb[7].mxu0 }
 0x14d   :  { %v592_v30 = vadd.f32 %v880_v27, %v552_v20 }
 0x14f   :  { %v632_v31 = vadd.f32 %v631_v21, %v592_v30 }
 0x151   :  { %v637_v32 = vmax.f32 %v632_v31, 0.0 }
 0x153   :  { %v638_v33 = vpack.c.bf16 %v637_v32, %v637_v32 }
 0x155   :  { %918 = vmatmul.mubr.bf16.vlgmr.msra.gmra.mrb[8].mxu1 %v638_v33 }
 0x228   :  { %v744_v35 = vpop.f32.mrb[8].mxu1 }
 0x229   :  { %v745_v36 = vadd.f32 %v809_v34, %v744_v35  ;;  %v919_v37 = vpop.f32.mrb[9].mxu1 }
 0x22a   :  { %v747_v38 = vpop.f32.mrb[10].mxu1 }
 0x22b   :  { %v750_v39 = vpack.c.bf16 %v745_v36, %v745_v36  ;;  %v920_v40 = vpop.f32.mrb[11].mxu1 }
 0x22d   :  { %751 = vst [vmem:[%s1161_s5] sm:$0xf] %v750_v39 }
 0x22e   :  { %756 = vsyncpa [#allocation3], 1 }
 0x22f   :  { %757 = vsyncpa [#allocation5], 1 }

</bundles_post_ra>
